<compile_context>
chip_gen: v7x
topology: tpu7x:2x2x1
jax: 0.10.0
libtpu: 0.0.40
codegen_flags: <defaults>
</compile_context>

<pallas_src>
import functools

import jax
import jax.numpy as jnp
from jax import lax
from jax.experimental import pallas as pl
from jax.experimental.pallas import tpu as pltpu


def _cosine_kernel(x1_ref, x2_ref, o_ref, x1n_ref, *, matmul_dtype):
    # x1_ref: (bt, F, tm)  x2_ref: (bt, F, tn)  o_ref: (bt, tm, tn)
    # x1n_ref: VMEM scratch (bt, F, tm) caching the feature-normalized x1 tile.

    # x1's block index ignores j, so its tile is DMA-resident across the inner
    # j loop; cache its (reduce + rsqrt + rescale) as well, once per (b, i).
    @pl.when(pl.program_id(2) == 0)
    def _():
        x1 = x1_ref[...]
        # NOTE: rsqrt(0)=inf -> 0*inf=NaN for all-zero columns, which matches
        # the reference's 0/0=NaN; only extreme overflow/underflow differs.
        inv_n1 = lax.rsqrt(jnp.sum(x1 * x1, axis=1, keepdims=True))  # (bt,1,tm)
        x1n_ref[...] = x1 * inv_n1

    x2 = x2_ref[...]
    inv_n2 = lax.rsqrt(jnp.sum(x2 * x2, axis=1, keepdims=True))      # (bt,1,tn)
    x2n = x2 * inv_n2

    # Batched feature-dim contraction on the MXU; result is already the
    # cosine distance (no output divide, no norm relayout).
    out = jnp.einsum(
        "bfm,bfn->bmn",
        x1n_ref[...].astype(matmul_dtype),
        x2n.astype(matmul_dtype),
        preferred_element_type=jnp.float32,
    )
    o_ref[...] = out.astype(o_ref.dtype)


def _vmem_capacity_bytes():
    """Per-core VMEM capacity; conservative (v7x-sized) fallback if the query fails."""
    try:
        cap = int(pltpu.get_tpu_info().vmem_capacity_bytes)
        if cap > 0:
            return cap
    except Exception:
        pass
    return 64 << 20


def _tile_candidates(extent):
    """Legal lane-dim tiles for `extent`: the full extent plus every multiple of
    128 that divides it, descending."""
    cands = {extent}
    t = 128
    while t < extent:
        if extent % t == 0:
            cands.add(t)
        t += 128
    return sorted(cands, reverse=True)


def _choose_tiles(B, F, T1, T2, budget_bytes, tm_pref):
    """Pick (bt, tm, tn) so that the double-buffered x1/x2/out tiles plus the
    normalized-x1 scratch fit the per-generation VMEM budget."""
    itemsize = 4  # f32 tiles / scratch

    def tile_bytes(bt, tm, tn):
        # 2x (double-buffered) x1, x2, out tiles + 1x x1n scratch.
        return itemsize * bt * (3 * F * tm + 2 * F * tn + 2 * tm * tn)

    tm_cands = _tile_candidates(T1)
    tn_cands = _tile_candidates(T2)

    chosen = None
    for tn in tn_cands:          # largest tn first: full-T2 slab => no x2 re-stream
        for tm in tm_cands:      # then the largest tm <= tm_pref that fits
            if tm > tm_pref and tm != tm_cands[-1]:
                continue
            if tile_bytes(1, tm, tn) <= budget_bytes:
                chosen = (tm, tn)
                break
        if chosen is not None:
            break
    if chosen is None:
        # Huge untiled F: nothing fits the budget; take the smallest legal tiles
        # and let vmem_limit_bytes stretch toward capacity.
        # TODO(synk): tile the feature dim (two-pass norm) for very large F.
        chosen = (tm_cands[-1], tn_cands[-1])
    tm, tn = chosen

    # Fold batches into one grid step when each per-batch tile is small
    # (amortizes the ~0.35 us / ~600 cycle per-grid-step overhead for tiny T).
    bt = 1
    if tm == T1 and tn == T2 and B > 1:
        for cand in range(min(B, 8), 1, -1):
            if B % cand == 0 and tile_bytes(cand, tm, tn) <= budget_bytes:
                bt = cand
                break
    return bt, tm, tn


def matrix_cosine_distance(x1, x2, f_dim=1, t_dim=2, *,
                           out_dtype=jnp.float32,
                           matmul_dtype=jnp.float32):
    """Pallas equivalent of MatrixCosineDistance(f_dim, t_dim)(x1, x2, mask=None).

    Expects 3-D inputs. If f_dim > t_dim, inputs are transposed (glue) to the
    canonical [B, F, T] layout first (matches the PyTorch `else` branch).
    `matmul_dtype=jnp.bfloat16` / `out_dtype=jnp.bfloat16` trade numerics for
    MXU rate / HBM writeback; defaults keep f32 parity with the module.
    """
    # TODO(synk): `mask` path (per-example Python loop over widths/heights) is
    # data-dependent host control flow; not implemented here (mask=None).
    assert x1.ndim == 3 and x2.ndim == 3
    if f_dim > t_dim:
        x1 = jnp.swapaxes(x1, f_dim, t_dim)
        x2 = jnp.swapaxes(x2, f_dim, t_dim)

    B, F, T1 = x1.shape
    B2, F2, T2 = x2.shape
    assert B == B2 and F == F2

    cap = _vmem_capacity_bytes()
    if cap <= (64 << 20):            # v7x-class part: 64 MiB per core
        budget = int(0.70 * cap)     # ~45 MiB
        tm_pref = 256
    else:                            # v5e / v6e: 128 MiB per core
        budget = min(int(0.78 * cap), 100 << 20)
        tm_pref = 512

    bt, tm, tn = _choose_tiles(B, F, T1, T2, budget, tm_pref)
    tile_bytes = 4 * bt * (3 * F * tm + 2 * F * tn + 2 * tm * tn)
    vmem_limit = int(min(max(tile_bytes + (4 << 20), 32 << 20), int(0.9 * cap)))

    grid = (B // bt, T1 // tm, T2 // tn)   # j (T2) innermost: x1 tile resident.

    kernel = functools.partial(_cosine_kernel, matmul_dtype=matmul_dtype)

    return pl.pallas_call(
        kernel,
        out_shape=jax.ShapeDtypeStruct((B, T1, T2), out_dtype),
        grid=grid,
        in_specs=[
            pl.BlockSpec((bt, F, tm), lambda b, i, j: (b, 0, i)),
            pl.BlockSpec((bt, F, tn), lambda b, i, j: (b, 0, j)),
        ],
        out_specs=pl.BlockSpec((bt, tm, tn), lambda b, i, j: (b, i, j)),
        scratch_shapes=[pltpu.VMEM((bt, F, tm), jnp.float32)],
        compiler_params=pltpu.CompilerParams(
            # j must stay "arbitrary": the x1n scratch is filled at j == 0, so
            # the j loop must run sequentially and never be megacore-sharded.
            dimension_semantics=("parallel", "parallel", "arbitrary"),
            vmem_limit_bytes=vmem_limit,
        ),
    )(x1, x2)


def _reference(x1, x2):
    # Pure-JAX reference of the f_dim=1 < t_dim=2 branch.
    n1 = jnp.linalg.norm(x1, axis=1, keepdims=True)     # (B, 1, T1)
    n2 = jnp.linalg.norm(x2, axis=1, keepdims=True)     # (B, 1, T2)
    norm = jnp.matmul(jnp.swapaxes(n1, 1, 2), n2)        # (B, T1, T2)
    prod = jnp.matmul(jnp.swapaxes(x1, 1, 2), x2)        # (B, T1, T2)
    return prod / norm


if __name__ == "__main__":
    # Small shapes consistent with the module: batch=2, feature=32, time=128.
    B, F, T = 2, 32, 128
    key = jax.random.PRNGKey(0)
    k1, k2 = jax.random.split(key)
    x1 = jax.random.normal(k1, (B, F, T), dtype=jnp.float32)
    x2 = jax.random.normal(k2, (B, F, T), dtype=jnp.float32)

    out = matrix_cosine_distance(x1, x2, f_dim=1, t_dim=2)
    out = jax.block_until_ready(out)

    ref = _reference(x1, x2)
    assert out.shape == (B, T, T)
    assert bool(jnp.allclose(out, ref, atol=1e-4, rtol=1e-4))

    print("KERNEL_OK")
</pallas_src>

<mosaic_0001>
module attributes {stable_mosaic.version = 11 : i64} {
  func.func @_cosine_kernel(%arg0: i32, %arg1: i32, %arg2: i32, %arg3: memref<2x32x128xf32, #tpu.memory_space<vmem>>, %arg4: memref<2x32x128xf32, #tpu.memory_space<vmem>>, %arg5: memref<2x128x128xf32, #tpu.memory_space<vmem>>, %arg6: memref<2x32x128xf32, #tpu.memory_space<vmem>>) attributes {dimension_semantics = [#tpu.dimension_semantics<parallel>, #tpu.dimension_semantics<parallel>, #tpu.dimension_semantics<arbitrary>], iteration_bounds = array<i64: 1, 1, 1>, scalar_prefetch = 0 : i64, scratch_operands = 1 : i64, tpu.core_type = #tpu.core_type<tc>, window_params = [{transform_indices = @transform_0, window_bounds = array<i64: 2, 32, 128>}, {transform_indices = @transform_1, window_bounds = array<i64: 2, 32, 128>}, {transform_indices = @transform_2, window_bounds = array<i64: 2, 128, 128>}]} {
    %c0_i32 = arith.constant 0 : i32
    %0 = arith.cmpi eq, %arg2, %c0_i32 : i32
    %1 = arith.extui %0 : i1 to i32
    %c0_i32_0 = arith.constant 0 : i32
    %2 = arith.cmpi ne, %1, %c0_i32_0 : i32
    scf.if %2 {
      %c0_10 = arith.constant 0 : index
      %c0_11 = arith.constant 0 : index
      %c0_12 = arith.constant 0 : index
      %13 = vector.load %arg3[%c0_10, %c0_11, %c0_12] : memref<2x32x128xf32, #tpu.memory_space<vmem>>, vector<2x32x128xf32>
      %14 = arith.mulf %13, %13 : vector<2x32x128xf32>
      %cst_13 = arith.constant dense<0.000000e+00> : vector<2x128xf32>
      %15 = vector.multi_reduction <add>, %14, %cst_13 [1] : vector<2x32x128xf32> to vector<2x128xf32>
      %16 = vector.shape_cast %15 : vector<2x128xf32> to vector<2x1x128xf32>
      %17 = math.rsqrt %16 : vector<2x1x128xf32>
      %18 = vector.broadcast %17 : vector<2x1x128xf32> to vector<2x32x128xf32>
      %19 = arith.mulf %13, %18 : vector<2x32x128xf32>
      %c0_14 = arith.constant 0 : index
      %c0_15 = arith.constant 0 : index
      %c0_16 = arith.constant 0 : index
      %20 = vector.load %arg6[%c0_14, %c0_15, %c0_16] : memref<2x32x128xf32, #tpu.memory_space<vmem>>, vector<2x32x128xf32>
      tpu.vector_store %arg6[%c0_14, %c0_15, %c0_16], %19 {strides = array<i32>} : memref<2x32x128xf32, #tpu.memory_space<vmem>>, vector<2x32x128xf32>,
    } else {
    }
    %c0 = arith.constant 0 : index
    %c0_1 = arith.constant 0 : index
    %c0_2 = arith.constant 0 : index
    %3 = vector.load %arg4[%c0, %c0_1, %c0_2] : memref<2x32x128xf32, #tpu.memory_space<vmem>>, vector<2x32x128xf32>
    %4 = arith.mulf %3, %3 : vector<2x32x128xf32>
    %cst = arith.constant dense<0.000000e+00> : vector<2x128xf32>
    %5 = vector.multi_reduction <add>, %4, %cst [1] : vector<2x32x128xf32> to vector<2x128xf32>
    %6 = vector.shape_cast %5 : vector<2x128xf32> to vector<2x1x128xf32>
    %7 = math.rsqrt %6 : vector<2x1x128xf32>
    %8 = vector.broadcast %7 : vector<2x1x128xf32> to vector<2x32x128xf32>
    %9 = arith.mulf %3, %8 : vector<2x32x128xf32>
    %c0_3 = arith.constant 0 : index
    %c0_4 = arith.constant 0 : index
    %c0_5 = arith.constant 0 : index
    %10 = vector.load %arg6[%c0_3, %c0_4, %c0_5] : memref<2x32x128xf32, #tpu.memory_space<vmem>>, vector<2x32x128xf32>
    "tpu.trace_start"() <{level = 10 : i32, message = "bfm,bfn->bmn"}> : () -> ()
    %cst_6 = arith.constant dense<0.000000e+00> : vector<2x128x128xf32>
    %11 = tpu.matmul %10, %9, %cst_6 {dimension_numbers = #tpu.dot_dimension_numbers<[1], [1], [2], [2], [0, 0, 0, 2, 1, 2], [0], [0]>} : vector<2x32x128xf32>, vector<2x32x128xf32>, vector<2x128x128xf32> -> vector<2x128x128xf32>
    "tpu.trace_stop"() : () -> ()
    %c0_7 = arith.constant 0 : index
    %c0_8 = arith.constant 0 : index
    %c0_9 = arith.constant 0 : index
    %12 = vector.load %arg5[%c0_7, %c0_8, %c0_9] : memref<2x128x128xf32, #tpu.memory_space<vmem>>, vector<2x128x128xf32>
    tpu.vector_store %arg5[%c0_7, %c0_8, %c0_9], %11 {strides = array<i32>} : memref<2x128x128xf32, #tpu.memory_space<vmem>>, vector<2x128x128xf32>,
    return
  }
  func.func @transform_0(%arg0: i32, %arg1: i32, %arg2: i32) -> (i32, i32, i32) {
    %c0_i32 = arith.constant 0 : i32
    %c0_i32_0 = arith.constant 0 : i32
    return %arg0, %c0_i32, %arg1 : i32, i32, i32
  }
  func.func @transform_1(%arg0: i32, %arg1: i32, %arg2: i32) -> (i32, i32, i32) {
    %c0_i32 = arith.constant 0 : i32
    %c0_i32_0 = arith.constant 0 : i32
    return %arg0, %c0_i32, %arg2 : i32, i32, i32
  }
  func.func @transform_2(%arg0: i32, %arg1: i32, %arg2: i32) -> (i32, i32, i32) {
    %c0_i32 = arith.constant 0 : i32
    return %arg0, %arg1, %arg2 : i32, i32, i32
  }
}

</mosaic_0001>

<bundles_post_ra>
// kernel: tpu_custom_call.1
= control target key start
LH: loop header
LB: loop body
LE: loop exit
PB: predicated region body
PF: predicated region fallthrough
CT: control target
= control target key end

     0   :  { %7 = vsyncpa [#allocation4], 0  ;;  %s1044_s0 = inlined_call_operand.hbm [shape: f32[2,32,128], index: 0, kind: input, shape index: {}]   ;;  %s1045_s1 = inlined_call_operand.hbm [shape: f32[2,32,128], index: 1, kind: input, shape index: {}]   ;;  %s1046_s2 = inlined_call_operand.hbm [shape: f32[2,128,128], index: 2, kind: output, shape index: {}]  }
   0x1   :  { %8 = vsyncpa [#allocation7], 0 }
   0x2   :  { %9 = vsyncpa [#allocation5], 0  ;;  %s887_s9 = smov [#allocation3]   ;;  %s815_s13 = scalar_lea.hbm %s1044_s0, 1024 }
   0x3   :  { %s15_s10 = sshll.u32 %s887_s9, 4  ;;  %p816_p0 = scmp.ne.s32.totalorder %s1044_s0, %s815_s13  ;;  %s16_s10 = int_to_ptr.vmem [resolvable:$true] %s15_s10 }
   0x4   :  { %p819_p1 = scmp.lt.u32.totalorder %s815_s13, %s1044_s0 }
   0x6   :  { %p821_p2 = pnand %p819_p1, %p816_p0 }
   0x8   :  { %824 = shalt.err (!%p821_p2)
}
   0x9   :  { %s825_s18 = scalar_lea.vmem %s16_s10, 1024  ;;  %p830_p4 = scmp.lt.s32.totalorder %s16_s10, %s16_s10 }
   0xa   :  { %p826_p3 = scmp.ne.s32.totalorder %s16_s10, %s825_s18  ;;  %p831_p5 = scmp.lt.s32.totalorder %s825_s18, %s825_s18 }
   0xc   :  { %p832_p6 = por %p831_p5, %p830_p4 }
   0xe   :  { %p833_p7 = pnand %p832_p6, %p826_p3 }
  0x10   :  { %836 = shalt.err (!%p833_p7)
}
  0x11   :  { %s888_s19 = smov 128   ;;  %s889_s20 = smov 8  }
  0x12   :  { %21 = dma.hbm_to_vmem [thread:$0]  %s1044_s0, 1024, %s16_s10, [#allocation4], %s888_s19, %s888_s19, %s889_s20  }
  0x13   :  { %s890_s23 = smov [#allocation6]   ;;  %s837_s27 = scalar_lea.hbm %s1045_s1, 1024 }
  0x14   :  { %s27_s24 = sshll.u32 %s890_s23, 4  ;;  %p838_p8 = scmp.ne.s32.totalorder %s1045_s1, %s837_s27  ;;  %s28_s24 = int_to_ptr.vmem [resolvable:$true] %s27_s24 }
  0x15   :  { %p841_p9 = scmp.lt.u32.totalorder %s837_s27, %s1045_s1 }
  0x17   :  { %p843_p10 = pnand %p841_p9, %p838_p8 }
  0x19   :  { %846 = shalt.err (!%p843_p10)
}
  0x1a   :  { %s847_s4 = scalar_lea.vmem %s28_s24, 1024  ;;  %p852_p12 = scmp.lt.s32.totalorder %s28_s24, %s28_s24 }
  0x1b   :  { %p848_p11 = scmp.ne.s32.totalorder %s28_s24, %s847_s4  ;;  %p853_p13 = scmp.lt.s32.totalorder %s847_s4, %s847_s4 }
  0x1d   :  { %p854_p0 = por %p853_p13, %p852_p12 }
  0x1f   :  { %p855_p1 = pnand %p854_p0, %p848_p11 }
  0x21   :  { %858 = shalt.err (!%p855_p1)
}
  0x22   :  { %33 = dma.hbm_to_vmem [thread:$0]  %s1045_s1, 1024, %s28_s24, [#allocation7], %s888_s19, %s888_s19, %s889_s20  }
  0x23   :  { %881 = dma.done.wait [#allocation4], 1024  }
  0x24   :  { %882 = vsyncadd [#allocation4], 4294966272 }
  0x25   :  { %883 = dma.done.wait [#allocation7], 1024  }
  0x26   :  { %884 = vsyncadd [#allocation7], 4294966272  ;;  %v937_v0 = vld [vmem:[#allocation3 + $0x20] sm:$0xff]  ;;  %v939_v1 = vld [vmem:[#allocation3 + $0x28] sm:$0xff]  ;;  %vm180_vm0 = vcmask 261120   ;;  %s891_s1 = smov [#allocation8]  }
  0x27   :  { %v941_v2 = vld [vmem:[#allocation3 + $0x30] sm:$0xff]  ;;  %v943_v3 = vld [vmem:[#allocation3 + $0x38] sm:$0xff]  ;;  %v56_v4 = vmul.f32 %v937_v0, %v937_v0  ;;  %v57_v5 = vmul.f32 %v939_v1, %v939_v1  ;;  %v951_v7 = vld [vmem:[#allocation3] sm:$0xff]  ;;  %s636_s6 = sshll.u32 %s891_s1, 4  ;;  %s637_s6 = int_to_ptr.vmem [resolvable:$true] %s636_s6 }
  0x28   :  { %v58_v6 = vmul.f32 %v941_v2, %v941_v2  ;;  %v953_v8 = vld [vmem:[#allocation3 + $0x8] sm:$0xff]  ;;  %v955_v9 = vld [vmem:[#allocation3 + $0x10] sm:$0xff]  ;;  %v957_v10 = vld [vmem:[#allocation3 + $0x18] sm:$0xff]  ;;  %v52_v11 = vmul.f32 %v951_v7, %v951_v7  ;;  %v59_v14 = vmul.f32 %v943_v3, %v943_v3  ;;  %s859_s7 = scalar_lea.vmem %s637_s6, 4096  ;;  %p864_p3 = scmp.lt.s32.totalorder %s637_s6, %s637_s6 }
  0x29   :  { %v53_v12 = vmul.f32 %v953_v8, %v953_v8  ;;  %v963_v13 = vld [vmem:[#allocation6] sm:$0xff]  ;;  %v69_v15 = vadd.f32 %v57_v5, %v56_v4  ;;  %v54_v16 = vmul.f32 %v955_v9, %v955_v9  ;;  %v969_v17 = vld [vmem:[#allocation6 + $0x8] sm:$0xff]  ;;  %v971_v18 = vld [vmem:[#allocation6 + $0x10] sm:$0xff]  ;;  %v55_v21 = vmul.f32 %v957_v10, %v957_v10  ;;  %p860_p2 = scmp.ne.s32.totalorder %s637_s6, %s859_s7  ;;  %p865_p4 = scmp.lt.s32.totalorder %s859_s7, %s859_s7 }
  0x2a   :  { %v973_v19 = vld [vmem:[#allocation6 + $0x18] sm:$0xff]  ;;  %v104_v20 = vmul.f32 %v963_v13, %v963_v13  ;;  %v105_v23 = vmul.f32 %v969_v17, %v969_v17  ;;  %v106_v24 = vmul.f32 %v971_v18, %v971_v18  ;;  %v100_v25 = vld [vmem:[#allocation6 + $0x20] sm:$0xff]  ;;  %v101_v26 = vld [vmem:[#allocation6 + $0x28] sm:$0xff] }
  0x2b   :  { %v60_v22 = vadd.f32 %v53_v12, %v52_v11  ;;  %v102_v27 = vld [vmem:[#allocation6 + $0x30] sm:$0xff]  ;;  %v70_v28 = vadd.f32 %v69_v15, %v58_v6  ;;  %v103_v29 = vld [vmem:[#allocation6 + $0x38] sm:$0xff]  ;;  %v108_v30 = vmul.f32 %v100_v25, %v100_v25  ;;  %v109_v31 = vmul.f32 %v101_v26, %v101_v26  ;;  %p866_p5 = por %p865_p4, %p864_p3 }
  0x2c   :  { %v110_v32 = vmul.f32 %v102_v27, %v102_v27  ;;  %v107_v34 = vmul.f32 %v973_v19, %v973_v19  ;;  %v112_v35 = vadd.f32 %v105_v23, %v104_v20  ;;  %v111_v37 = vmul.f32 %v103_v29, %v103_v29 }
  0x2d   :  { %v61_v33 = vadd.f32 %v60_v22, %v54_v16  ;;  %v71_v36 = vadd.f32 %v70_v28, %v59_v14  ;;  %v121_v38 = vadd.f32 %v109_v31, %v108_v30  ;;  %p867_p6 = pnand %p866_p5, %p860_p2 }
  0x2e   :  { %v113_v40 = vadd.f32 %v112_v35, %v106_v24 }
  0x2f   :  { %v62_v39 = vadd.f32 %v61_v33, %v55_v21  ;;  %v72_v41 = vrot.slane %v71_v36, 4  ;;  %v122_v42 = vadd.f32 %v121_v38, %v110_v32 }
  0x30   :  { %v114_v44 = vadd.f32 %v113_v40, %v107_v34 }
  0x31   :  { %v63_v43 = vrot.slane %v62_v39, 4  ;;  %v73_v45 = vadd.f32 %v72_v41, %v71_v36  ;;  %v123_v46 = vadd.f32 %v122_v42, %v111_v37 }
  0x32   :  { %v115_v48 = vrot.slane %v114_v44, 4 }
  0x33   :  { %v64_v47 = vadd.f32 %v63_v43, %v62_v39  ;;  %v74_v49 = vrot.slane %v73_v45, 2  ;;  %v124_v50 = vrot.slane %v123_v46, 4 }
  0x34   :  { %v116_v52 = vadd.f32 %v115_v48, %v114_v44 }
  0x35   :  { %v65_v51 = vrot.slane %v64_v47, 2  ;;  %v75_v53 = vadd.f32 %v74_v49, %v73_v45  ;;  %v125_v54 = vadd.f32 %v124_v50, %v123_v46 }
  0x36   :  { %v117_v56 = vrot.slane %v116_v52, 2 }
  0x37   :  { %v66_v55 = vadd.f32 %v65_v51, %v64_v47  ;;  %v76_v57 = vrot.slane %v75_v53, 1  ;;  %v126_v58 = vrot.slane %v125_v54, 2 }
  0x38   :  { %v118_v60 = vadd.f32 %v117_v56, %v116_v52 }
  0x39   :  { %v67_v59 = vrot.slane %v66_v55, 1  ;;  %v77_v61 = vadd.f32 %v76_v57, %v75_v53  ;;  %v127_v62 = vadd.f32 %v126_v58, %v125_v54 }
  0x3a   :  { %v119_v4 = vrot.slane %v118_v60, 1 }
  0x3b   :  { %v68_v63 = vadd.f32 %v67_v59, %v66_v55  ;;  %807 = vrsqrt.f32 %v77_v61  ;;  %v128_v5 = vrot.slane %v127_v62, 1 }
  0x3c   :  { %v120_v6 = vadd.f32 %v119_v4, %v118_v60 }
  0x3d   :  { %809 = vrsqrt.f32 %v68_v63  ;;  %v129_v11 = vadd.f32 %v128_v5, %v127_v62 }
  0x3e   :  { %811 = vrsqrt.f32 %v120_v6 }
  0x3f   :  { %813 = vrsqrt.f32 %v129_v11 }
  0x45   :  { %v808_v12 = vpop.eup %807 }
  0x46   :  { %v84_v15 = vmul.f32 %v808_v12, %v937_v0  ;;  %v85_v21 = vmul.f32 %v808_v12, %v939_v1  ;;  %v86_v1 = vmul.f32 %v808_v12, %v941_v2 }
  0x47   :  { %v810_v14 = vpop.eup %809 }
  0x48   :  { %v80_v16 = vmul.f32 %v810_v14, %v951_v7  ;;  %v812_v20 = vpop.eup %811  ;;  %374 = vxpose.xlu1.b32.start [1/4] (short) %v84_v15, 128  ;;  %v81_v22 = vmul.f32 %v810_v14, %v953_v8  ;;  %v82_v36 = vmul.f32 %v810_v14, %v955_v9 }
  0x49   :  { %v814_v23 = vpop.eup %813  ;;  %v132_v24 = vmul.f32 %v812_v20, %v963_v13  ;;  %v133_v28 = vmul.f32 %v812_v20, %v969_v17  ;;  %v134_v30 = vmul.f32 %v812_v20, %v971_v18  ;;  %v135_v31 = vmul.f32 %v812_v20, %v973_v19 }
  0x4a   :  { %148 = vxpose.xlu0.b32.start [1/4] (short) %v80_v16, 128  ;;  %v136_v32 = vmul.f32 %v814_v23, %v100_v25  ;;  %v137_v0 = vmul.f32 %v814_v23, %v101_v26  ;;  %v138_v33 = vmul.f32 %v814_v23, %v102_v27  ;;  %v139_v35 = vmul.f32 %v814_v23, %v103_v29 }
  0x4b   :  { %v785_v7 = vpack.c.bf16 %v133_v28, %v132_v24  ;;  %v789_v34 = vpack.c.bf16 %v135_v31, %v134_v30  ;;  %v87_v17 = vmul.f32 %v808_v12, %v943_v3  ;;  %v83_v18 = vmul.f32 %v810_v14, %v957_v10 }
  0x4c   :  { %375 = vxpose.xlu1.b32.cont [2/4] (short) %v85_v21, 128  ;;  %v793_v8 = vpack.c.bf16 %v137_v0, %v136_v32  ;;  %v797_v13 = vpack.c.bf16 %v139_v35, %v138_v33 }
  0x4d   :  { %786 = vmatprep.subr.bf16.mxu0 %v785_v7 }
  0x4e   :  { %149 = vxpose.xlu0.b32.cont [2/4] (short) %v81_v22, 128  ;;  %794 = vmatprep.subr.bf16.mxu1 %v793_v8 }
  0x4f   :  { %788 = vmatpush3.bf16.msra.mxu0 %v785_v7  ;;  %796 = vmatpush3.bf16.msra.mxu1 %v793_v8 }
  0x50   :  { %790 = vmatprep.subr.bf16.mxu0 %v789_v34  ;;  %376 = vxpose.xlu1.b32.cont [3/4] (short) %v86_v1, 128 }
  0x51   :  { %798 = vmatprep.subr.bf16.mxu1 %v797_v13 }
  0x52   :  { %150 = vxpose.xlu0.b32.cont [3/4] (short) %v82_v36, 128 }
  0x53   :  { %792 = vmatpush3.bf16.msra.mxu0 %v789_v34  ;;  %800 = vmatpush3.bf16.msra.mxu1 %v797_v13 }
  0x54   :  { %377 = vxpose.xlu1.b32.end [4/4] (short) %v87_v17, 128 }
  0x56   :  { %151 = vxpose.xlu0.b32.end [4/4] (short) %v83_v18, 128 }
  0xc8   :  { %v390_v2 = vpop.trf.xlu1 }
  0xc9   :  { %761 = vmatprep.mubr.msk.f32.mxu1 %vm180_vm0, %v390_v2 }
  0xca   :  { %v164_v9 = vpop.trf.xlu0 }
  0xcb   :  { %729 = vmatprep.mubr.msk.f32.mxu0 %vm180_vm0, %v164_v9 }
  0xcc   :  { %v391_v19 = vpop.trf.xlu1 }
  0xcd   :  { %762 = vmatmul.mubr.msk.f32.vlgmr.msra.gmra.mrb[0].mxu1 %vm180_vm0, %v391_v19 }
  0xce   :  { %v165_v25 = vpop.trf.xlu0 }
  0xcf   :  { %730 = vmatmul.mubr.msk.f32.vlgmr.msra.gmra.mrb[0].mxu0 %vm180_vm0, %v165_v25 }
  0xd0   :  { %v392_v3 = vpop.trf.xlu1 }
  0xd1   :  { %764 = vmatprep.mubr.msk.f32.mxu1 %vm180_vm0, %v392_v3 }
  0xd2   :  { %v166_v26 = vpop.trf.xlu0 }
  0xd3   :  { %732 = vmatprep.mubr.msk.f32.mxu0 %vm180_vm0, %v166_v26 }
  0xd4   :  { %v393_v10 = vpop.trf.xlu1 }
  0xd5   :  { %765 = vmatmul.mubr.msk.f32.gmra.mrb[2].mxu1 %vm180_vm0, %v393_v10 }
  0xd6   :  { %v167_v27 = vpop.trf.xlu0 }
  0xd7   :  { %733 = vmatmul.mubr.msk.f32.gmra.mrb[2].mxu0 %vm180_vm0, %v167_v27 }
  0xd8   :  { %v394_v29 = vpop.trf.xlu1 }
  0xd9   :  { %767 = vmatprep.mubr.msk.f32.mxu1 %vm180_vm0, %v394_v29 }
  0xda   :  { %v168_v37 = vpop.trf.xlu0 }
  0xdb   :  { %735 = vmatprep.mubr.msk.f32.mxu0 %vm180_vm0, %v168_v37 }
  0xdc   :  { %v395_v38 = vpop.trf.xlu1 }
  0xdd   :  { %768 = vmatmul.mubr.msk.f32.gmra.mrb[4].mxu1 %vm180_vm0, %v395_v38 }
  0xde   :  { %v169_v39 = vpop.trf.xlu0 }
  0xdf   :  { %736 = vmatmul.mubr.msk.f32.gmra.mrb[4].mxu0 %vm180_vm0, %v169_v39 }
  0xe0   :  { %v396_v40 = vpop.trf.xlu1 }
  0xe1   :  { %770 = vmatprep.mubr.msk.f32.mxu1 %vm180_vm0, %v396_v40 }
  0xe2   :  { %v170_v41 = vpop.trf.xlu0 }
  0xe3   :  { %738 = vmatprep.mubr.msk.f32.mxu0 %vm180_vm0, %v170_v41 }
  0xe4   :  { %v397_v42 = vpop.trf.xlu1 }
  0xe5   :  { %771 = vmatmul.mubr.msk.f32.gmra.mrb[6].mxu1 %vm180_vm0, %v397_v42 }
  0xe6   :  { %v171_v43 = vpop.trf.xlu0 }
  0xe7   :  { %739 = vmatmul.mubr.msk.f32.gmra.mrb[6].mxu0 %vm180_vm0, %v171_v43 }
  0xe8   :  { %v398_v44 = vpop.trf.xlu1 }
  0xe9   :  { %773 = vmatprep.mubr.msk.f32.mxu1 %vm180_vm0, %v398_v44 }
  0xea   :  { %v172_v45 = vpop.trf.xlu0 }
  0xeb   :  { %741 = vmatprep.mubr.msk.f32.mxu0 %vm180_vm0, %v172_v45 }
  0xec   :  { %v399_v46 = vpop.trf.xlu1 }
  0xed   :  { %774 = vmatmul.mubr.msk.f32.gmra.mrb[8].mxu1 %vm180_vm0, %v399_v46 }
  0xee   :  { %v173_v47 = vpop.trf.xlu0 }
  0xef   :  { %742 = vmatmul.mubr.msk.f32.gmra.mrb[8].mxu0 %vm180_vm0, %v173_v47 }
  0xf0   :  { %v400_v48 = vpop.trf.xlu1 }
  0xf1   :  { %776 = vmatprep.mubr.msk.f32.mxu1 %vm180_vm0, %v400_v48 }
  0xf2   :  { %v174_v49 = vpop.trf.xlu0 }
  0xf3   :  { %744 = vmatprep.mubr.msk.f32.mxu0 %vm180_vm0, %v174_v49 }
  0xf4   :  { %v401_v50 = vpop.trf.xlu1 }
  0xf5   :  { %777 = vmatmul.mubr.msk.f32.gmra.mrb[10].mxu1 %vm180_vm0, %v401_v50 }
  0xf6   :  { %v175_v51 = vpop.trf.xlu0 }
  0xf7   :  { %745 = vmatmul.mubr.msk.f32.gmra.mrb[10].mxu0 %vm180_vm0, %v175_v51 }
  0xf8   :  { %v402_v52 = vpop.trf.xlu1 }
  0xf9   :  { %779 = vmatprep.mubr.msk.f32.mxu1 %vm180_vm0, %v402_v52 }
  0xfa   :  { %v176_v53 = vpop.trf.xlu0 }
  0xfb   :  { %747 = vmatprep.mubr.msk.f32.mxu0 %vm180_vm0, %v176_v53 }
  0xfc   :  { %v403_v54 = vpop.trf.xlu1 }
  0xfd   :  { %780 = vmatmul.mubr.msk.f32.gmra.mrb[12].mxu1 %vm180_vm0, %v403_v54 }
  0xfe   :  { %v177_v55 = vpop.trf.xlu0 }
  0xff   :  { %748 = vmatmul.mubr.msk.f32.gmra.mrb[12].mxu0 %vm180_vm0, %v177_v55 }
 0x100   :  { %v404_v56 = vpop.trf.xlu1 }
 0x101   :  { %782 = vmatprep.mubr.msk.f32.mxu1 %vm180_vm0, %v404_v56 }
 0x102   :  { %v178_v57 = vpop.trf.xlu0 }
 0x103   :  { %750 = vmatprep.mubr.msk.f32.mxu0 %vm180_vm0, %v178_v57 }
 0x104   :  { %v405_v58 = vpop.trf.xlu1 }
 0x105   :  { %783 = vmatmul.mubr.msk.f32.gmra.mrb[14].mxu1 %vm180_vm0, %v405_v58 }
 0x106   :  { %v179_v59 = vpop.trf.xlu0 }
 0x107   :  { %751 = vmatmul.mubr.msk.f32.gmra.mrb[14].mxu0 %vm180_vm0, %v179_v59 }
 0x1a0   :  { %v763_v60 = vpop.f32.mrb[0].mxu1 }
 0x1a1   :  { %616 = vst [vmem:[#allocation8 + $0x88] sm:$0xff] %v763_v60  ;;  %v520_v62 = vpop.f32.mrb[1].mxu1 }
 0x1a2   :  { %v731_v61 = vpop.f32.mrb[0].mxu0  ;;  %615 = vst [vmem:[#allocation8 + $0x80] sm:$0xff] %v520_v62 }
 0x1a3   :  { %600 = vst [vmem:[#allocation8 + $0x8] sm:$0xff] %v731_v61  ;;  %v295_v63 = vpop.f32.mrb[1].mxu0 }
 0x1a4   :  { %599 = vst [vmem:[#allocation8] sm:$0xff] %v295_v63 }
 0x1a8   :  { %v766_v4 = vpop.f32.mrb[2].mxu1 }
 0x1a9   :  { %618 = vst [vmem:[#allocation8 + $0x98] sm:$0xff] %v766_v4  ;;  %v530_v6 = vpop.f32.mrb[3].mxu1 }
 0x1aa   :  { %v734_v5 = vpop.f32.mrb[2].mxu0  ;;  %617 = vst [vmem:[#allocation8 + $0x90] sm:$0xff] %v530_v6 }
 0x1ab   :  { %602 = vst [vmem:[#allocation8 + $0x18] sm:$0xff] %v734_v5  ;;  %v305_v11 = vpop.f32.mrb[3].mxu0 }
 0x1ac   :  { %601 = vst [vmem:[#allocation8 + $0x10] sm:$0xff] %v305_v11 }
 0x1b0   :  { %v769_v12 = vpop.f32.mrb[4].mxu1 }
 0x1b1   :  { %620 = vst [vmem:[#allocation8 + $0xa8] sm:$0xff] %v769_v12  ;;  %v540_v15 = vpop.f32.mrb[5].mxu1 }
 0x1b2   :  { %v737_v14 = vpop.f32.mrb[4].mxu0  ;;  %619 = vst [vmem:[#allocation8 + $0xa0] sm:$0xff] %v540_v15 }
 0x1b3   :  { %604 = vst [vmem:[#allocation8 + $0x28] sm:$0xff] %v737_v14  ;;  %v315_v16 = vpop.f32.mrb[5].mxu0 }
 0x1b4   :  { %603 = vst [vmem:[#allocation8 + $0x20] sm:$0xff] %v315_v16 }
 0x1b8   :  { %v772_v20 = vpop.f32.mrb[6].mxu1 }
 0x1b9   :  { %622 = vst [vmem:[#allocation8 + $0xb8] sm:$0xff] %v772_v20  ;;  %v550_v22 = vpop.f32.mrb[7].mxu1 }
 0x1ba   :  { %v740_v21 = vpop.f32.mrb[6].mxu0  ;;  %621 = vst [vmem:[#allocation8 + $0xb0] sm:$0xff] %v550_v22 }
 0x1bb   :  { %606 = vst [vmem:[#allocation8 + $0x38] sm:$0xff] %v740_v21  ;;  %v325_v23 = vpop.f32.mrb[7].mxu0 }
 0x1bc   :  { %605 = vst [vmem:[#allocation8 + $0x30] sm:$0xff] %v325_v23 }
 0x1c0   :  { %v775_v24 = vpop.f32.mrb[8].mxu1 }
 0x1c1   :  { %624 = vst [vmem:[#allocation8 + $0xc8] sm:$0xff] %v775_v24  ;;  %v560_v30 = vpop.f32.mrb[9].mxu1 }
 0x1c2   :  { %v743_v28 = vpop.f32.mrb[8].mxu0  ;;  %623 = vst [vmem:[#allocation8 + $0xc0] sm:$0xff] %v560_v30 }
 0x1c3   :  { %608 = vst [vmem:[#allocation8 + $0x48] sm:$0xff] %v743_v28  ;;  %v335_v31 = vpop.f32.mrb[9].mxu0 }
 0x1c4   :  { %607 = vst [vmem:[#allocation8 + $0x40] sm:$0xff] %v335_v31 }
 0x1c8   :  { %v778_v32 = vpop.f32.mrb[10].mxu1 }
 0x1c9   :  { %626 = vst [vmem:[#allocation8 + $0xd8] sm:$0xff] %v778_v32  ;;  %v570_v33 = vpop.f32.mrb[11].mxu1 }
 0x1ca   :  { %v746_v0 = vpop.f32.mrb[10].mxu0  ;;  %625 = vst [vmem:[#allocation8 + $0xd0] sm:$0xff] %v570_v33 }
 0x1cb   :  { %610 = vst [vmem:[#allocation8 + $0x58] sm:$0xff] %v746_v0  ;;  %v345_v7 = vpop.f32.mrb[11].mxu0 }
 0x1cc   :  { %609 = vst [vmem:[#allocation8 + $0x50] sm:$0xff] %v345_v7 }
 0x1d0   :  { %v781_v34 = vpop.f32.mrb[12].mxu1 }
 0x1d1   :  { %628 = vst [vmem:[#allocation8 + $0xe8] sm:$0xff] %v781_v34  ;;  %v580_v1 = vpop.f32.mrb[13].mxu1 }
 0x1d2   :  { %v749_v35 = vpop.f32.mrb[12].mxu0  ;;  %627 = vst [vmem:[#allocation8 + $0xe0] sm:$0xff] %v580_v1 }
 0x1d3   :  { %612 = vst [vmem:[#allocation8 + $0x68] sm:$0xff] %v749_v35  ;;  %v355_v8 = vpop.f32.mrb[13].mxu0 }
 0x1d4   :  { %611 = vst [vmem:[#allocation8 + $0x60] sm:$0xff] %v355_v8 }
 0x1d8   :  { %v784_v36 = vpop.f32.mrb[14].mxu1 }
 0x1d9   :  { %630 = vst [vmem:[#allocation8 + $0xf8] sm:$0xff] %v784_v36  ;;  %v590_v17 = vpop.f32.mrb[15].mxu1 }
 0x1da   :  { %v752_v13 = vpop.f32.mrb[14].mxu0  ;;  %629 = vst [vmem:[#allocation8 + $0xf0] sm:$0xff] %v590_v17 }
 0x1db   :  { %614 = vst [vmem:[#allocation8 + $0x78] sm:$0xff] %v752_v13  ;;  %v365_v18 = vpop.f32.mrb[15].mxu0 }
 0x1dc   :  { %613 = vst [vmem:[#allocation8 + $0x70] sm:$0xff] %v365_v18 }
 0x1dd   :  { %870 = shalt.err (!%p867_p6)
}
 0x1de   :  { %s871_s10 = scalar_lea.hbm %s1046_s2, 4096 }
 0x1df   :  { %p872_p7 = scmp.ne.s32.totalorder %s1046_s2, %s871_s10  ;;  %p875_p8 = scmp.lt.u32.totalorder %s871_s10, %s1046_s2 }
 0x1e1   :  { %p877_p9 = pnand %p875_p8, %p872_p7 }
 0x1e3   :  { %880 = shalt.err (!%p877_p9)
}
 0x1e4   :  { %642 = dma.vmem_to_hbm [thread:$0]  %s637_s6, 4096, %s1046_s2, [#allocation5], %s888_s19, %s888_s19, %s889_s20  }
 0x1e5   :  { %885 = dma.done.wait [#allocation5], 4096  }
 0x1e6   :  { %886 = vsyncadd [#allocation5], 4294963200 }
 0x1e7   :  { %646 = vsyncpa [#allocation4], 1 }
 0x1e8   :  { %647 = vsyncpa [#allocation7], 1 }
 0x1e9   :  { %648 = vsyncpa [#allocation5], 1 }

</bundles_post_ra>
